<compile_context>
chip_gen: v6e
topology: v6e:2x2x1
jax: 0.10.0
libtpu: 0.0.40
codegen_flags: <defaults>
</compile_context>

<pallas_src>
import functools

import jax
import jax.numpy as jnp
from jax.experimental import pallas as pl
from jax.experimental.pallas import tpu as pltpu

LANES = 128


def _round_up(x, m):
    return (x + m - 1) // m * m


def _xtanh_kernel(a_ref, b_ref, o_ref, acc_ref, *, valid_rows, tile_rows,
                  tiles_per_core, num_tiles, apply_mask):
    c = pl.program_id(0)   # TensorCore split axis ("parallel")
    i = pl.program_id(1)   # row-tile reduction axis ("arbitrary")

    @pl.when(i == 0)
    def _():
        acc_ref[...] = jnp.zeros_like(acc_ref)

    e = a_ref[...].astype(jnp.float32) - b_ref[...].astype(jnp.float32)
    v = e * jnp.tanh(e)

    def fold(x):
        # (tile_rows, 128) -> (8, 128): sublane-aligned VPU adds only; the one
        # cross-lane (XLU) reduce happens once per core in the epilogue.
        return x.reshape(tile_rows // 8, 8, LANES).sum(axis=0)

    if apply_mask:
        t = c * tiles_per_core + i        # un-clamped global tile index
        is_edge = t >= num_tiles - 1      # straddling tile or clamped duplicate

        @pl.when(jnp.logical_not(is_edge))
        def _():
            # Hot path: no iota / compare / select.
            acc_ref[...] += fold(v)

        @pl.when(is_edge)
        def _():
            row = jax.lax.broadcasted_iota(jnp.int32, (tile_rows, LANES), 0)
            keep = (t * tile_rows + row) < valid_rows
            # Select-based mask: discards any garbage (incl. NaN/Inf) read from
            # overhanging / duplicated blocks.
            acc_ref[...] += fold(jnp.where(keep, v, 0.0))
    else:
        acc_ref[...] += fold(v)

    @pl.when(i == pl.num_programs(1) - 1)
    def _():
        o_ref[...] = jnp.full(o_ref.shape, jnp.sum(acc_ref[...]), o_ref.dtype)


def xtanh_loss(y_t, y_prime_t, tile_rows=4096):
    assert y_t.shape == y_prime_t.shape, (y_t.shape, y_prime_t.shape)
    n = y_t.size
    assert n > 0

    a = jnp.ravel(y_t)
    b = jnp.ravel(y_prime_t)

    # Minimal (< 128 elem, only if needed) lane pad so the flat vector views as
    # a lane-dense (rows, 128) slab; padded zeros contribute 0 * tanh(0) == 0.
    pad = (-n) % LANES
    if pad:
        a = jnp.pad(a, (0, pad))
        b = jnp.pad(b, (0, pad))
    rows = (n + pad) // LANES
    a = a.reshape(rows, LANES)
    b = b.reshape(rows, LANES)

    # ---- tile sizing --------------------------------------------------------
    # Big tiles amortize per-grid-step overhead, but keep >= MIN_STEPS steps so
    # the double-buffered DMA pipeline actually overlaps prefetch with compute.
    MIN_STEPS = 4
    rows8 = _round_up(rows, 8)
    tile_rows = _round_up(max(8, min(tile_rows, rows8)), 8)
    if pl.cdiv(rows, tile_rows) < MIN_STEPS and rows8 >= MIN_STEPS * 8:
        tile_rows = _round_up(pl.cdiv(rows, MIN_STEPS), 8)
    num_tiles = pl.cdiv(rows, tile_rows)

    # ---- optional 2-way TensorCore split (v7x megacore) ---------------------
    # Only split when each core still gets >= MIN_STEPS tiles; on 1-TC chips
    # (v5e/v6e) the size-1 leading axis keeps this a flat reduction loop.
    if num_tiles >= 2 * MIN_STEPS:
        n_cores = 2
        tiles_per_core = pl.cdiv(num_tiles, n_cores)
        # Best effort: re-derive the tile so the count splits evenly across the
        # two cores (avoids a redundant, fully-masked clamped tile).
        tile_rows = _round_up(pl.cdiv(rows, n_cores * tiles_per_core), 8)
        num_tiles = pl.cdiv(rows, tile_rows)
        tiles_per_core = pl.cdiv(num_tiles, n_cores)
    else:
        n_cores = 1
        tiles_per_core = num_tiles

    needs_mask = n_cores * tiles_per_core * tile_rows > rows
    clamp_needed = n_cores * tiles_per_core > num_tiles

    def tile_index(c, i):
        t = c * tiles_per_core + i
        if clamp_needed:
            # Out-of-range (core, tile) pairs re-read the last tile; the
            # in-kernel edge mask zeroes their contribution.
            t = jnp.minimum(t, num_tiles - 1)
        return (t, 0)

    kernel = functools.partial(
        _xtanh_kernel,
        valid_rows=rows,
        tile_rows=tile_rows,
        tiles_per_core=tiles_per_core,
        num_tiles=num_tiles,
        apply_mask=needs_mask,
    )

    # VMEM budget: 2 inputs x 2 pipeline buffers x tile + (8,128) accumulator
    # + output slabs. Pass an explicit limit with headroom.
    itemsize = jnp.dtype(a.dtype).itemsize
    vmem_bytes = (2 * 2 * tile_rows * LANES * itemsize
                  + 8 * LANES * 4
                  + 2 * 8 * LANES * 4)
    vmem_limit = int(min(max(1.5 * vmem_bytes + (1 << 20), 32 << 20), 48 << 20))

    partials = pl.pallas_call(
        kernel,
        # One (8, 128) partial-sum slab per core (lane-dense output block; only
        # element [c, 0, 0] is consumed by the wrapper).
        out_shape=jax.ShapeDtypeStruct((n_cores, 8, LANES), jnp.float32),
        grid_spec=pltpu.PrefetchScalarGridSpec(
            num_scalar_prefetch=0,
            grid=(n_cores, tiles_per_core),
            in_specs=[
                pl.BlockSpec((tile_rows, LANES), tile_index),
                pl.BlockSpec((tile_rows, LANES), tile_index),
            ],
            out_specs=pl.BlockSpec((1, 8, LANES), lambda c, i: (c, 0, 0)),
            scratch_shapes=[pltpu.VMEM((8, LANES), jnp.float32)],
        ),
        compiler_params=pltpu.CompilerParams(
            dimension_semantics=("parallel", "arbitrary"),
            vmem_limit_bytes=vmem_limit,
        ),
    )(a, b)

    # Tiny final cross-core reduce + mean division (n is static Python int).
    return jnp.sum(partials[:, 0, 0]) / n


if __name__ == "__main__":
    key = jax.random.PRNGKey(0)

    def ref_loss(y_t, y_prime_t):
        e = y_t.astype(jnp.float32) - y_prime_t.astype(jnp.float32)
        return jnp.mean(e * jnp.tanh(e))

    def check(shape, tile_rows, k):
        k1, k2 = jax.random.split(k)
        y_t = jax.random.normal(k1, shape, dtype=jnp.float32)
        y_p = jax.random.normal(k2, shape, dtype=jnp.float32)
        out = xtanh_loss(y_t, y_p, tile_rows=tile_rows)
        jax.block_until_ready(out)
        expected = ref_loss(y_t, y_p)
        assert jnp.allclose(out, expected, rtol=1e-4, atol=1e-6), (
            shape, tile_rows, out, expected)

    keys = jax.random.split(key, 5)
    # Primary NCHW-like example: default tiling -> single lane-dense tile.
    check((2, 4, 16, 16), 4096, keys[0])
    # Multi-tile, single-core path with a straddling (masked) last tile.
    check((20, 128), 8, keys[1])
    # 2-core split, even tile count, last tile straddles the valid rows.
    check((75, 128), 8, keys[2])
    # 2-core split with an odd tile count -> clamped, fully-masked duplicate.
    check((72, 128), 8, keys[3])
    # Element count not a multiple of 128 -> minimal lane pad + overhang mask.
    check((3, 5, 7, 11), 4096, keys[4])

    print("KERNEL_OK")
</pallas_src>

<mosaic_0001>
module attributes {stable_mosaic.version = 11 : i64} {
  func.func @_xtanh_kernel(%arg0: i32, %arg1: i32, %arg2: memref<16x128xf32, #tpu.memory_space<vmem>>, %arg3: memref<16x128xf32, #tpu.memory_space<vmem>>, %arg4: memref<1x8x128xf32, #tpu.memory_space<vmem>>, %arg5: memref<8x128xf32, #tpu.memory_space<vmem>>) attributes {dimension_semantics = [#tpu.dimension_semantics<parallel>, #tpu.dimension_semantics<arbitrary>], iteration_bounds = array<i64: 1, 1>, scalar_prefetch = 0 : i64, scratch_operands = 1 : i64, tpu.core_type = #tpu.core_type<tc>, window_params = [{transform_indices = @transform_0, window_bounds = array<i64: 16, 128>}, {transform_indices = @transform_1, window_bounds = array<i64: 16, 128>}, {transform_indices = @transform_2, window_bounds = array<i64: 1, 8, 128>}]} {
    %c0_i32 = arith.constant 0 : i32
    %0 = arith.cmpi eq, %arg1, %c0_i32 : i32
    %1 = arith.extui %0 : i1 to i32
    %c0_i32_0 = arith.constant 0 : i32
    %2 = arith.cmpi ne, %1, %c0_i32_0 : i32
    scf.if %2 {
      %cst_10 = arith.constant 0.000000e+00 : f32
      %16 = vector.broadcast %cst_10 : f32 to vector<8x128xf32>
      %c0_11 = arith.constant 0 : index
      %c0_12 = arith.constant 0 : index
      %17 = vector.load %arg5[%c0_11, %c0_12] : memref<8x128xf32, #tpu.memory_space<vmem>>, vector<8x128xf32>
      tpu.vector_store %arg5[%c0_11, %c0_12], %16 {strides = array<i32>} : memref<8x128xf32, #tpu.memory_space<vmem>>, vector<8x128xf32>,
    } else {
    }
    %c0 = arith.constant 0 : index
    %c0_1 = arith.constant 0 : index
    %3 = vector.load %arg2[%c0, %c0_1] : memref<16x128xf32, #tpu.memory_space<vmem>>, vector<16x128xf32>
    %c0_2 = arith.constant 0 : index
    %c0_3 = arith.constant 0 : index
    %4 = vector.load %arg3[%c0_2, %c0_3] : memref<16x128xf32, #tpu.memory_space<vmem>>, vector<16x128xf32>
    %5 = arith.subf %3, %4 : vector<16x128xf32>
    %6 = math.tanh %5 : vector<16x128xf32>
    %7 = arith.mulf %5, %6 : vector<16x128xf32>
    %c0_4 = arith.constant 0 : index
    %c0_5 = arith.constant 0 : index
    %8 = vector.load %arg5[%c0_4, %c0_5] : memref<8x128xf32, #tpu.memory_space<vmem>>, vector<8x128xf32>
    %9 = vector.shape_cast %7 : vector<16x128xf32> to vector<2x8x128xf32>
    %cst = arith.constant dense<0.000000e+00> : vector<8x128xf32>
    %10 = vector.multi_reduction <add>, %9, %cst [0] : vector<2x8x128xf32> to vector<8x128xf32>
    %11 = arith.addf %8, %10 : vector<8x128xf32>
    %c0_6 = arith.constant 0 : index
    %c0_7 = arith.constant 0 : index
    %12 = vector.load %arg5[%c0_6, %c0_7] : memref<8x128xf32, #tpu.memory_space<vmem>>, vector<8x128xf32>
    tpu.vector_store %arg5[%c0_6, %c0_7], %11 {strides = array<i32>} : memref<8x128xf32, #tpu.memory_space<vmem>>, vector<8x128xf32>,
    %c0_i32_8 = arith.constant 0 : i32
    %13 = arith.cmpi eq, %arg1, %c0_i32_8 : i32
    %14 = arith.extui %13 : i1 to i32
    %c0_i32_9 = arith.constant 0 : i32
    %15 = arith.cmpi ne, %14, %c0_i32_9 : i32
    scf.if %15 {
      %c0_10 = arith.constant 0 : index
      %c0_11 = arith.constant 0 : index
      %16 = vector.load %arg5[%c0_10, %c0_11] : memref<8x128xf32, #tpu.memory_space<vmem>>, vector<8x128xf32>
      %17 = vector.shape_cast %16 : vector<8x128xf32> to vector<1x8x128xf32>
      %cst_12 = arith.constant dense<0.000000e+00> : vector<1xf32>
      %18 = vector.multi_reduction <add>, %17, %cst_12 [1, 2] : vector<1x8x128xf32> to vector<1xf32>
      %19 = vector.shape_cast %18 : vector<1xf32> to vector<1x1x1xf32>
      %20 = vector.extract %19[0, 0, 0] : f32 from vector<1x1x1xf32>
      %21 = vector.broadcast %20 : f32 to vector<1x8x128xf32>
      %c0_13 = arith.constant 0 : index
      %c0_14 = arith.constant 0 : index
      %c0_15 = arith.constant 0 : index
      %22 = vector.load %arg4[%c0_13, %c0_14, %c0_15] : memref<1x8x128xf32, #tpu.memory_space<vmem>>, vector<1x8x128xf32>
      tpu.vector_store %arg4[%c0_13, %c0_14, %c0_15], %21 {strides = array<i32>} : memref<1x8x128xf32, #tpu.memory_space<vmem>>, vector<1x8x128xf32>,
    } else {
    }
    return
  }
  func.func @transform_0(%arg0: i32, %arg1: i32) -> (i32, i32) {
    %c1_i32 = arith.constant 1 : i32
    %0 = arith.muli %arg0, %c1_i32 : i32
    %1 = arith.addi %0, %arg1 : i32
    %c0_i32 = arith.constant 0 : i32
    %c0_i32_0 = arith.constant 0 : i32
    return %1, %c0_i32 : i32, i32
  }
  func.func @transform_1(%arg0: i32, %arg1: i32) -> (i32, i32) {
    %c1_i32 = arith.constant 1 : i32
    %0 = arith.muli %arg0, %c1_i32 : i32
    %1 = arith.addi %0, %arg1 : i32
    %c0_i32 = arith.constant 0 : i32
    %c0_i32_0 = arith.constant 0 : i32
    return %1, %c0_i32 : i32, i32
  }
  func.func @transform_2(%arg0: i32, %arg1: i32) -> (i32, i32, i32) {
    %c0_i32 = arith.constant 0 : i32
    %c0_i32_0 = arith.constant 0 : i32
    %c0_i32_1 = arith.constant 0 : i32
    return %arg0, %c0_i32, %c0_i32_0 : i32, i32, i32
  }
}

</mosaic_0001>

<bundles_post_ra>
// kernel: tpu_custom_call.1
= control target key start
LH: loop header
LB: loop body
LE: loop exit
PB: predicated region body
PF: predicated region fallthrough
CT: control target
= control target key end

     0   :  { %7 = vsyncpa [#allocation4], 0  ;;  %s208_s0 = inlined_call_operand.hbm [shape: f32[16,128], index: 0, kind: input, shape index: {}]   ;;  %s209_s1 = inlined_call_operand.hbm [shape: f32[16,128], index: 1, kind: input, shape index: {}]   ;;  %s210_s2 = inlined_call_operand.hbm [shape: f32[1,8,128], index: 2, kind: output, shape index: {}]  }
   0x1   :  { %8 = vsyncpa [#allocation7], 0 }
   0x2   :  { %9 = vsyncpa [#allocation5], 0  ;;  %s179_s9 = smov [#allocation3]  }
   0x3   :  { %s19_s10 = sshll.u32 %s179_s9, 4  ;;  %s20_s10 = int_to_ptr.vmem [resolvable:$true] %s19_s10 }
   0x4   :  { %s121_s11 = scalar_lea.vmem %s20_s10, 256  ;;  %p126_p1 = scmp.lt.s32.totalorder %s20_s10, %s20_s10 }
   0x5   :  { %p122_p0 = scmp.ne.s32.totalorder %s20_s10, %s121_s11  ;;  %p127_p2 = scmp.lt.s32.totalorder %s121_s11, %s121_s11 }
   0x7   :  { %p128_p3 = por %p127_p2, %p126_p1 }
   0x9   :  { %p129_p4 = pnand %p128_p3, %p122_p0 }
   0xb   :  { %132 = shalt.err (!%p129_p4)
}
   0xc   :  { %s180_s12 = smov 128   ;;  %s181_s13 = smov 8  }
   0xd   :  { %25 = dma.hbm_to_vmem [thread:$0]  %s208_s0, 256, %s20_s10, [#allocation4], %s180_s12, %s180_s12, %s181_s13  }
   0xe   :  { %s182_s16 = smov [#allocation6]  }
   0xf   :  { %s35_s17 = sshll.u32 %s182_s16, 4  ;;  %s36_s17 = int_to_ptr.vmem [resolvable:$true] %s35_s17 }
  0x10   :  { %s141_s18 = scalar_lea.vmem %s36_s17, 256  ;;  %p146_p6 = scmp.lt.s32.totalorder %s36_s17, %s36_s17 }
  0x11   :  { %p142_p5 = scmp.ne.s32.totalorder %s36_s17, %s141_s18  ;;  %p147_p7 = scmp.lt.s32.totalorder %s141_s18, %s141_s18 }
  0x13   :  { %p148_p8 = por %p147_p7, %p146_p6 }
  0x15   :  { %p149_p9 = pnand %p148_p8, %p142_p5 }
  0x17   :  { %152 = shalt.err (!%p149_p9)
}
  0x18   :  { %41 = dma.hbm_to_vmem [thread:$0]  %s209_s1, 256, %s36_s17, [#allocation7], %s180_s12, %s180_s12, %s181_s13  }
  0x19   :  { %173 = dma.done.wait [#allocation4], 256  }
  0x1a   :  { %174 = vsyncadd [#allocation4], 4294967040 }
  0x1b   :  { %175 = dma.done.wait [#allocation7], 256  }
  0x1c   :  { %176 = vsyncadd [#allocation7], 4294967040  ;;  %v57_v0 = vld [vmem:[#allocation3] sm:$0xff]  ;;  %v58_v1 = vld [vmem:[#allocation3 + $0x8] sm:$0xff]  ;;  %s183_s0 = smov [#allocation8]  }
  0x1d   :  { %v59_v2 = vld [vmem:[#allocation6] sm:$0xff]  ;;  %v60_v3 = vld [vmem:[#allocation6 + $0x8] sm:$0xff]  ;;  %s92_s1 = sshll.u32 %s183_s0, 4  ;;  %s93_s1 = int_to_ptr.vmem [resolvable:$true] %s92_s1 }
  0x1e   :  { %v61_v4 = vsub.f32 %v57_v0, %v59_v2  ;;  %v62_v5 = vsub.f32 %v58_v1, %v60_v3  ;;  %s153_s22 = scalar_lea.vmem %s93_s1, 128  ;;  %p158_p11 = scmp.lt.s32.totalorder %s93_s1, %s93_s1 }
  0x1f   :  { %p154_p10 = scmp.ne.s32.totalorder %s93_s1, %s153_s22  ;;  %p159_p12 = scmp.lt.s32.totalorder %s153_s22, %s153_s22 }
  0x20   :  { %109 = vtanh.f32 %v61_v4 }
  0x21   :  { %111 = vtanh.f32 %v62_v5  ;;  %p160_p13 = por %p159_p12, %p158_p11 }
  0x23   :  { %p161_p0 = pnand %p160_p13, %p154_p10 }
  0x2d   :  { %v110_v6 = vpop.eup %109 }
  0x2e   :  { %v112_v7 = vpop.eup %111  ;;  %v65_v8 = vmul.f32 %v110_v6, %v61_v4 }
  0x2f   :  { %v66_v9 = vmul.f32 %v112_v7, %v62_v5 }
  0x31   :  { %v68_v10 = vadd.f32 %v66_v9, %v65_v8 }
  0x33   :  { %75 = vadd.xlane.f32.xlu0 %v68_v10 }
  0xbc   :  { %v76_v11 = vpop.xlane.xlu0 %75 }
  0xbd   :  { %v77_v12 = vrot.slane %v76_v11, 4 }
  0xbf   :  { %v78_v13 = vadd.f32 %v77_v12, %v76_v11 }
  0xc1   :  { %v79_v14 = vrot.slane %v78_v13, 2 }
  0xc3   :  { %v80_v15 = vadd.f32 %v79_v14, %v78_v13 }
  0xc5   :  { %v81_v16 = vrot.slane %v80_v15, 1 }
  0xc7   :  { %v82_v17 = vadd.f32 %v81_v16, %v80_v15 }
  0xc9   :  { %102 = vpush %v82_v17 }
  0xfa   :  { %s103_s21 = spop %102 }
  0xfb   :  { %v84_v18 = vstv %s103_s21 }
  0xfc   :  { %85 = vst [vmem:[#allocation8] sm:$0xff] %v84_v18 }
  0xfd   :  { %164 = shalt.err (!%p161_p0)
}
  0xfe   :  { %95 = dma.vmem_to_hbm [thread:$0]  %s93_s1, 128, %s210_s2, [#allocation5]  }
  0xff   :  { %177 = dma.done.wait [#allocation5], 128  }
 0x100   :  { %178 = vsyncadd [#allocation5], 4294967168 }
 0x101   :  { %99 = vsyncpa [#allocation4], 1 }
 0x102   :  { %100 = vsyncpa [#allocation7], 1 }
 0x103   :  { %101 = vsyncpa [#allocation5], 1 }

</bundles_post_ra>
